<compile_context>
chip_gen: v5e
topology: v5e:2x2
jax: 0.10.0
libtpu: 0.0.40
codegen_flags: <defaults>
</compile_context>

<pallas_src>
import functools

import jax
import jax.numpy as jnp
from jax.experimental import pallas as pl
from jax.experimental.pallas import tpu as pltpu


def _round_up(a, b):
    return (a + b - 1) // b * b


def connnet_kernel(x_ref,
                   w1_ref, b1_ref,
                   w2_ref, b2_ref,
                   w3_ref, b3_ref,
                   w4_ref, b4_ref,
                   o_ref):
    """One batch tile of the fused 4-layer MLP + softmax."""
    x = x_ref[...]                      # (TB, in_dim) f32
    w1 = w1_ref[...]                    # (in_dim, 128) f32

    # ---- fc1: tiny contraction (K = in_dim) -> VPU broadcast-FMAs, skip MXU.
    in_dim = w1_ref.shape[0]
    h = x[:, 0:1] * w1[0:1, :]
    for k in range(1, in_dim):          # static unrolled loop (in_dim is tiny)
        h = h + x[:, k:k + 1] * w1[k:k + 1, :]
    h = jnp.maximum(h + b1_ref[...], 0.0)

    # ---- fc2 + relu (bf16 MXU inputs, f32 accumulate, f32 elementwise)
    h = jnp.dot(h.astype(jnp.bfloat16), w2_ref[...],
                preferred_element_type=jnp.float32) + b2_ref[...]
    h = jnp.maximum(h, 0.0)

    # ---- fc3 + relu
    h = jnp.dot(h.astype(jnp.bfloat16), w3_ref[...],
                preferred_element_type=jnp.float32) + b3_ref[...]
    h = jnp.maximum(h, 0.0)

    # ---- dropout: identity in eval mode (training=False)

    # ---- fc4: output padded to 128 lanes; padded bias lanes are -1e30 so the
    #      padded lanes contribute ~0 to the softmax (exp underflows to 0).
    logits = jnp.dot(h.astype(jnp.bfloat16), w4_ref[...],
                     preferred_element_type=jnp.float32) + b4_ref[...]

    # ---- softmax over dim=1 (eval mode)
    m = jnp.max(logits, axis=1, keepdims=True)
    e = jnp.exp(logits - m)
    denom = jnp.sum(e, axis=1, keepdims=True)
    o_ref[...] = (e * pl.reciprocal(denom, approx=True)).astype(o_ref.dtype)


@functools.partial(jax.jit, static_argnames=("tile_batch",))
def connnet_forward(x, params, tile_batch=512):
    """x: (batch, in_dim) f32. params: dict of weights/biases (f32)."""
    batch, in_dim = x.shape
    out_dim = params["w4"].shape[1]
    lanes = 128

    # Lane-dense (padded) output width.
    out_pad = _round_up(max(out_dim, lanes), lanes)

    # Batch tile: multiple of 8, capped at tile_batch; pad batch to a multiple.
    tb = min(tile_batch, _round_up(batch, 8))
    padded_batch = _round_up(batch, tb)
    n_tiles = padded_batch // tb

    x_p = x.astype(jnp.float32)
    if padded_batch != batch:
        x_p = jnp.pad(x_p, ((0, padded_batch - batch), (0, 0)))

    # fc1 stays f32 (VPU path); fc2-fc4 weights cast to bf16 for the MXU.
    w1 = params["w1"].astype(jnp.float32)
    b1 = params["b1"].astype(jnp.float32)
    w2 = params["w2"].astype(jnp.bfloat16)
    b2 = params["b2"].astype(jnp.float32)
    w3 = params["w3"].astype(jnp.bfloat16)
    b3 = params["b3"].astype(jnp.float32)

    # Pad fc4 to a lane-dense output: zero weight columns, -1e30 bias lanes.
    pad_cols = out_pad - out_dim
    w4 = jnp.pad(params["w4"].astype(jnp.float32),
                 ((0, 0), (0, pad_cols))).astype(jnp.bfloat16)
    b4 = jnp.pad(params["b4"].astype(jnp.float32),
                 ((0, 0), (0, pad_cols)),
                 constant_values=jnp.float32(-1e30))

    def const_spec(shape):
        return pl.BlockSpec(shape, lambda i: (0,) * len(shape))

    in_specs = [
        pl.BlockSpec((tb, in_dim), lambda i: (i, 0)),   # x: tiled over batch
        const_spec(w1.shape), const_spec(b1.shape),     # weights: VMEM-resident
        const_spec(w2.shape), const_spec(b2.shape),
        const_spec(w3.shape), const_spec(b3.shape),
        const_spec(w4.shape), const_spec(b4.shape),
    ]
    out_specs = pl.BlockSpec((tb, out_pad), lambda i: (i, 0))

    out_padded = pl.pallas_call(
        connnet_kernel,
        out_shape=jax.ShapeDtypeStruct((padded_batch, out_pad), jnp.float32),
        grid=(n_tiles,),
        in_specs=in_specs,
        out_specs=out_specs,
        compiler_params=pltpu.CompilerParams(
            dimension_semantics=("parallel",),
            vmem_limit_bytes=32 * 1024 * 1024,
        ),
    )(x_p, w1, b1, w2, b2, w3, b3, w4, b4)

    return out_padded[:batch, :out_dim]


def init_params(key, in_dim=4, out_dim=2, hidden=128):
    """Deterministic init mimicking PyTorch Linear (uniform +/- 1/sqrt(fan_in))."""
    def linear(k, fan_in, fan_out):
        kw, kb = jax.random.split(k)
        bound = 1.0 / jnp.sqrt(fan_in)
        w = jax.random.uniform(kw, (fan_in, fan_out), jnp.float32, -bound, bound)
        b = jax.random.uniform(kb, (1, fan_out), jnp.float32, -bound, bound)
        return w, b

    k1, k2, k3, k4 = jax.random.split(key, 4)
    w1, b1 = linear(k1, in_dim, hidden)
    w2, b2 = linear(k2, hidden, hidden)
    w3, b3 = linear(k3, hidden, hidden)
    w4, b4 = linear(k4, hidden, out_dim)
    return {"w1": w1, "b1": b1, "w2": w2, "b2": b2,
            "w3": w3, "b3": b3, "w4": w4, "b4": b4}


def reference_forward_f32(x, p):
    """Pure-JAX f32 reference (eval-mode ConnNet)."""
    h = jnp.maximum(x @ p["w1"] + p["b1"], 0.0)
    h = jnp.maximum(h @ p["w2"] + p["b2"], 0.0)
    h = jnp.maximum(h @ p["w3"] + p["b3"], 0.0)
    logits = h @ p["w4"] + p["b4"]
    return jax.nn.softmax(logits, axis=1)


def reference_forward_bf16(x, p):
    """Pure-JAX reference matching the kernel's bf16-input / f32-accum dots."""
    bf = lambda a: a.astype(jnp.bfloat16)
    h = jnp.maximum(x @ p["w1"] + p["b1"], 0.0)                       # fc1 in f32
    h = jnp.maximum(jnp.dot(bf(h), bf(p["w2"]),
                            preferred_element_type=jnp.float32) + p["b2"], 0.0)
    h = jnp.maximum(jnp.dot(bf(h), bf(p["w3"]),
                            preferred_element_type=jnp.float32) + p["b3"], 0.0)
    logits = jnp.dot(bf(h), bf(p["w4"]),
                     preferred_element_type=jnp.float32) + p["b4"]
    return jax.nn.softmax(logits, axis=1)


if __name__ == "__main__":
    key = jax.random.PRNGKey(0)
    kx, kp = jax.random.split(key)

    batch, in_dim, out_dim = 8, 4, 2
    x = jax.random.normal(kx, (batch, in_dim), jnp.float32)
    params = init_params(kp, in_dim=in_dim, out_dim=out_dim, hidden=128)

    out = connnet_forward(x, params)
    out = jax.block_until_ready(out)

    ref_bf16 = reference_forward_bf16(x, params)
    ref_f32 = reference_forward_f32(x, params)

    assert out.shape == (batch, out_dim)
    # Match the bf16-input reference tightly; approx reciprocal + accumulation
    # order gives tiny extra slack.
    assert jnp.allclose(out, ref_bf16, atol=5e-3, rtol=5e-3), "mismatch vs bf16 reference"
    # Stay close to the full-f32 reference as well.
    assert jnp.allclose(out, ref_f32, atol=3e-2, rtol=3e-2), "mismatch vs f32 reference"
    # rows sum to ~1 (softmax)
    assert jnp.allclose(jnp.sum(out, axis=1), jnp.ones((batch,)), atol=5e-3)

    print("KERNEL_OK")
</pallas_src>

<mosaic_0001>
module attributes {stable_mosaic.version = 11 : i64} {
  func.func @connnet_kernel(%arg0: i32, %arg1: memref<8x4xf32, #tpu.memory_space<vmem>>, %arg2: memref<4x128xf32, #tpu.memory_space<vmem>>, %arg3: memref<1x128xf32, #tpu.memory_space<vmem>>, %arg4: memref<128x128xbf16, #tpu.memory_space<vmem>>, %arg5: memref<1x128xf32, #tpu.memory_space<vmem>>, %arg6: memref<128x128xbf16, #tpu.memory_space<vmem>>, %arg7: memref<1x128xf32, #tpu.memory_space<vmem>>, %arg8: memref<128x128xbf16, #tpu.memory_space<vmem>>, %arg9: memref<1x128xf32, #tpu.memory_space<vmem>>, %arg10: memref<8x128xf32, #tpu.memory_space<vmem>>) attributes {dimension_semantics = [#tpu.dimension_semantics<parallel>], iteration_bounds = array<i64: 1>, scalar_prefetch = 0 : i64, scratch_operands = 0 : i64, tpu.core_type = #tpu.core_type<tc>, window_params = [{transform_indices = @transform_0, window_bounds = array<i64: 8, 4>}, {pipeline_mode = #tpu.pipeline_mode<synchronous>, transform_indices = @transform_1, window_bounds = array<i64: 4, 128>}, {pipeline_mode = #tpu.pipeline_mode<synchronous>, transform_indices = @transform_2, window_bounds = array<i64: 1, 128>}, {pipeline_mode = #tpu.pipeline_mode<synchronous>, transform_indices = @transform_3, window_bounds = array<i64: 128, 128>}, {pipeline_mode = #tpu.pipeline_mode<synchronous>, transform_indices = @transform_4, window_bounds = array<i64: 1, 128>}, {pipeline_mode = #tpu.pipeline_mode<synchronous>, transform_indices = @transform_5, window_bounds = array<i64: 128, 128>}, {pipeline_mode = #tpu.pipeline_mode<synchronous>, transform_indices = @transform_6, window_bounds = array<i64: 1, 128>}, {pipeline_mode = #tpu.pipeline_mode<synchronous>, transform_indices = @transform_7, window_bounds = array<i64: 128, 128>}, {pipeline_mode = #tpu.pipeline_mode<synchronous>, transform_indices = @transform_8, window_bounds = array<i64: 1, 128>}, {transform_indices = @transform_9, window_bounds = array<i64: 8, 128>}]} {
    %c0 = arith.constant 0 : index
    %c0_0 = arith.constant 0 : index
    %0 = vector.load %arg1[%c0, %c0_0] : memref<8x4xf32, #tpu.memory_space<vmem>>, vector<8x4xf32>
    %c0_1 = arith.constant 0 : index
    %c0_2 = arith.constant 0 : index
    %1 = vector.load %arg2[%c0_1, %c0_2] : memref<4x128xf32, #tpu.memory_space<vmem>>, vector<4x128xf32>
    %2 = vector.extract_strided_slice %0 {offsets = [0, 0], sizes = [8, 1], strides = [1, 1]} : vector<8x4xf32> to vector<8x1xf32>
    %3 = vector.extract_strided_slice %1 {offsets = [0, 0], sizes = [1, 128], strides = [1, 1]} : vector<4x128xf32> to vector<1x128xf32>
    %4 = vector.broadcast %2 : vector<8x1xf32> to vector<8x128xf32>
    %5 = vector.broadcast %3 : vector<1x128xf32> to vector<8x128xf32>
    %6 = arith.mulf %4, %5 : vector<8x128xf32>
    %7 = vector.extract_strided_slice %0 {offsets = [0, 1], sizes = [8, 1], strides = [1, 1]} : vector<8x4xf32> to vector<8x1xf32>
    %8 = vector.extract_strided_slice %1 {offsets = [1, 0], sizes = [1, 128], strides = [1, 1]} : vector<4x128xf32> to vector<1x128xf32>
    %9 = vector.broadcast %7 : vector<8x1xf32> to vector<8x128xf32>
    %10 = vector.broadcast %8 : vector<1x128xf32> to vector<8x128xf32>
    %11 = arith.mulf %9, %10 : vector<8x128xf32>
    %12 = arith.addf %6, %11 : vector<8x128xf32>
    %13 = vector.extract_strided_slice %0 {offsets = [0, 2], sizes = [8, 1], strides = [1, 1]} : vector<8x4xf32> to vector<8x1xf32>
    %14 = vector.extract_strided_slice %1 {offsets = [2, 0], sizes = [1, 128], strides = [1, 1]} : vector<4x128xf32> to vector<1x128xf32>
    %15 = vector.broadcast %13 : vector<8x1xf32> to vector<8x128xf32>
    %16 = vector.broadcast %14 : vector<1x128xf32> to vector<8x128xf32>
    %17 = arith.mulf %15, %16 : vector<8x128xf32>
    %18 = arith.addf %12, %17 : vector<8x128xf32>
    %19 = vector.extract_strided_slice %0 {offsets = [0, 3], sizes = [8, 1], strides = [1, 1]} : vector<8x4xf32> to vector<8x1xf32>
    %20 = vector.extract_strided_slice %1 {offsets = [3, 0], sizes = [1, 128], strides = [1, 1]} : vector<4x128xf32> to vector<1x128xf32>
    %21 = vector.broadcast %19 : vector<8x1xf32> to vector<8x128xf32>
    %22 = vector.broadcast %20 : vector<1x128xf32> to vector<8x128xf32>
    %23 = arith.mulf %21, %22 : vector<8x128xf32>
    %24 = arith.addf %18, %23 : vector<8x128xf32>
    %c0_3 = arith.constant 0 : index
    %c0_4 = arith.constant 0 : index
    %25 = vector.load %arg3[%c0_3, %c0_4] : memref<1x128xf32, #tpu.memory_space<vmem>>, vector<1x128xf32>
    %26 = vector.broadcast %25 : vector<1x128xf32> to vector<8x128xf32>
    %27 = arith.addf %24, %26 : vector<8x128xf32>
    %cst = arith.constant 0.000000e+00 : f32
    %28 = vector.broadcast %cst : f32 to vector<8x128xf32>
    %29 = arith.maximumf %27, %28 : vector<8x128xf32>
    %30 = arith.truncf %29 : vector<8x128xf32> to vector<8x128xbf16>
    %c0_5 = arith.constant 0 : index
    %c0_6 = arith.constant 0 : index
    %31 = vector.load %arg4[%c0_5, %c0_6] : memref<128x128xbf16, #tpu.memory_space<vmem>>, vector<128x128xbf16>
    %cst_7 = arith.constant dense<0.000000e+00> : vector<8x128xf32>
    %32 = tpu.matmul %30, %31, %cst_7 {dimension_numbers = #tpu.dot_dimension_numbers<[1], [0], [0], [1], [0, 0, 1, 1], [], []>} : vector<8x128xbf16>, vector<128x128xbf16>, vector<8x128xf32> -> vector<8x128xf32>
    %c0_8 = arith.constant 0 : index
    %c0_9 = arith.constant 0 : index
    %33 = vector.load %arg5[%c0_8, %c0_9] : memref<1x128xf32, #tpu.memory_space<vmem>>, vector<1x128xf32>
    %34 = vector.broadcast %33 : vector<1x128xf32> to vector<8x128xf32>
    %35 = arith.addf %32, %34 : vector<8x128xf32>
    %cst_10 = arith.constant 0.000000e+00 : f32
    %36 = vector.broadcast %cst_10 : f32 to vector<8x128xf32>
    %37 = arith.maximumf %35, %36 : vector<8x128xf32>
    %38 = arith.truncf %37 : vector<8x128xf32> to vector<8x128xbf16>
    %c0_11 = arith.constant 0 : index
    %c0_12 = arith.constant 0 : index
    %39 = vector.load %arg6[%c0_11, %c0_12] : memref<128x128xbf16, #tpu.memory_space<vmem>>, vector<128x128xbf16>
    %cst_13 = arith.constant dense<0.000000e+00> : vector<8x128xf32>
    %40 = tpu.matmul %38, %39, %cst_13 {dimension_numbers = #tpu.dot_dimension_numbers<[1], [0], [0], [1], [0, 0, 1, 1], [], []>} : vector<8x128xbf16>, vector<128x128xbf16>, vector<8x128xf32> -> vector<8x128xf32>
    %c0_14 = arith.constant 0 : index
    %c0_15 = arith.constant 0 : index
    %41 = vector.load %arg7[%c0_14, %c0_15] : memref<1x128xf32, #tpu.memory_space<vmem>>, vector<1x128xf32>
    %42 = vector.broadcast %41 : vector<1x128xf32> to vector<8x128xf32>
    %43 = arith.addf %40, %42 : vector<8x128xf32>
    %cst_16 = arith.constant 0.000000e+00 : f32
    %44 = vector.broadcast %cst_16 : f32 to vector<8x128xf32>
    %45 = arith.maximumf %43, %44 : vector<8x128xf32>
    %46 = arith.truncf %45 : vector<8x128xf32> to vector<8x128xbf16>
    %c0_17 = arith.constant 0 : index
    %c0_18 = arith.constant 0 : index
    %47 = vector.load %arg8[%c0_17, %c0_18] : memref<128x128xbf16, #tpu.memory_space<vmem>>, vector<128x128xbf16>
    %cst_19 = arith.constant dense<0.000000e+00> : vector<8x128xf32>
    %48 = tpu.matmul %46, %47, %cst_19 {dimension_numbers = #tpu.dot_dimension_numbers<[1], [0], [0], [1], [0, 0, 1, 1], [], []>} : vector<8x128xbf16>, vector<128x128xbf16>, vector<8x128xf32> -> vector<8x128xf32>
    %c0_20 = arith.constant 0 : index
    %c0_21 = arith.constant 0 : index
    %49 = vector.load %arg9[%c0_20, %c0_21] : memref<1x128xf32, #tpu.memory_space<vmem>>, vector<1x128xf32>
    %50 = vector.broadcast %49 : vector<1x128xf32> to vector<8x128xf32>
    %51 = arith.addf %48, %50 : vector<8x128xf32>
    %cst_22 = arith.constant dense<0xFF800000> : vector<8xf32>
    %52 = vector.multi_reduction <maximumf>, %51, %cst_22 [1] : vector<8x128xf32> to vector<8xf32>
    %53 = vector.shape_cast %52 : vector<8xf32> to vector<8x1xf32>
    %54 = vector.broadcast %53 : vector<8x1xf32> to vector<8x128xf32>
    %55 = arith.subf %51, %54 : vector<8x128xf32>
    %56 = math.exp %55 : vector<8x128xf32>
    %cst_23 = arith.constant dense<0.000000e+00> : vector<8xf32>
    %57 = vector.multi_reduction <add>, %56, %cst_23 [1] : vector<8x128xf32> to vector<8xf32>
    %58 = vector.shape_cast %57 : vector<8xf32> to vector<8x1xf32>
    %59 = tpu.reciprocal %58 {approx = true} : vector<8x1xf32> -> vector<8x1xf32>
    %60 = vector.broadcast %59 : vector<8x1xf32> to vector<8x128xf32>
    %61 = arith.mulf %56, %60 : vector<8x128xf32>
    %c0_24 = arith.constant 0 : index
    %c0_25 = arith.constant 0 : index
    %62 = vector.load %arg10[%c0_24, %c0_25] : memref<8x128xf32, #tpu.memory_space<vmem>>, vector<8x128xf32>
    tpu.vector_store %arg10[%c0_24, %c0_25], %61 {strides = array<i32>} : memref<8x128xf32, #tpu.memory_space<vmem>>, vector<8x128xf32>,
    return
  }
  func.func @transform_0(%arg0: i32) -> (i32, i32) {
    %c0_i32 = arith.constant 0 : i32
    %c0_i32_0 = arith.constant 0 : i32
    return %arg0, %c0_i32 : i32, i32
  }
  func.func @transform_1(%arg0: i32) -> (i32, i32) {
    %c0_i32 = arith.constant 0 : i32
    %c0_i32_0 = arith.constant 0 : i32
    %c0_i32_1 = arith.constant 0 : i32
    return %c0_i32, %c0_i32_0 : i32, i32
  }
  func.func @transform_2(%arg0: i32) -> (i32, i32) {
    %c0_i32 = arith.constant 0 : i32
    %c0_i32_0 = arith.constant 0 : i32
    %c0_i32_1 = arith.constant 0 : i32
    return %c0_i32, %c0_i32_0 : i32, i32
  }
  func.func @transform_3(%arg0: i32) -> (i32, i32) {
    %c0_i32 = arith.constant 0 : i32
    %c0_i32_0 = arith.constant 0 : i32
    %c0_i32_1 = arith.constant 0 : i32
    return %c0_i32, %c0_i32_0 : i32, i32
  }
  func.func @transform_4(%arg0: i32) -> (i32, i32) {
    %c0_i32 = arith.constant 0 : i32
    %c0_i32_0 = arith.constant 0 : i32
    %c0_i32_1 = arith.constant 0 : i32
    return %c0_i32, %c0_i32_0 : i32, i32
  }
  func.func @transform_5(%arg0: i32) -> (i32, i32) {
    %c0_i32 = arith.constant 0 : i32
    %c0_i32_0 = arith.constant 0 : i32
    %c0_i32_1 = arith.constant 0 : i32
    return %c0_i32, %c0_i32_0 : i32, i32
  }
  func.func @transform_6(%arg0: i32) -> (i32, i32) {
    %c0_i32 = arith.constant 0 : i32
    %c0_i32_0 = arith.constant 0 : i32
    %c0_i32_1 = arith.constant 0 : i32
    return %c0_i32, %c0_i32_0 : i32, i32
  }
  func.func @transform_7(%arg0: i32) -> (i32, i32) {
    %c0_i32 = arith.constant 0 : i32
    %c0_i32_0 = arith.constant 0 : i32
    %c0_i32_1 = arith.constant 0 : i32
    return %c0_i32, %c0_i32_0 : i32, i32
  }
  func.func @transform_8(%arg0: i32) -> (i32, i32) {
    %c0_i32 = arith.constant 0 : i32
    %c0_i32_0 = arith.constant 0 : i32
    %c0_i32_1 = arith.constant 0 : i32
    return %c0_i32, %c0_i32_0 : i32, i32
  }
  func.func @transform_9(%arg0: i32) -> (i32, i32) {
    %c0_i32 = arith.constant 0 : i32
    %c0_i32_0 = arith.constant 0 : i32
    return %arg0, %c0_i32 : i32, i32
  }
}

</mosaic_0001>

<bundles_post_ra>
// kernel: connnet_forward.1
= control target key start
LH: loop header
LB: loop body
LE: loop exit
PB: predicated region body
PF: predicated region fallthrough
CT: control target
= control target key end

     0   :  { %v467_v0 = vmov 0   ;;  %v468_v2 = vmov 2   ;;  %v469_v5 = vmov 1   ;;  %v470_v6 = vmov 3   ;;  %s614_s0 = inlined_call_operand.vmem [shape: f32[8,4], index: 0, kind: input, shape index: {}]   ;;  %s615_s3 = inlined_call_operand.vmem [shape: bf16[128,128], index: 3, kind: input, shape index: {}]   ;;  %s616_s2 = inlined_call_operand.vmem [shape: f32[1,128], index: 2, kind: input, shape index: {}]   ;;  %s617_s4 = inlined_call_operand.vmem [shape: f32[1,128], index: 4, kind: input, shape index: {}]   ;;  %s618_s5 = inlined_call_operand.vmem [shape: bf16[128,128], index: 5, kind: input, shape index: {}]   ;;  %s619_s1 = inlined_call_operand.vmem [shape: f32[4,128], index: 1, kind: input, shape index: {}]   ;;  %s620_s6 = inlined_call_operand.vmem [shape: f32[1,128], index: 6, kind: input, shape index: {}]   ;;  %s621_s7 = inlined_call_operand.vmem [shape: bf16[128,128], index: 7, kind: input, shape index: {}]   ;;  %s622_s8 = inlined_call_operand.vmem [shape: f32[1,128], index: 8, kind: input, shape index: {}]   ;;  %s623_s9 = inlined_call_operand.vmem [shape: f32[8,128], index: 9, kind: output, shape index: {}]  }
   0x1   :  { %454 = vset.pattern.permute.xlu0 %v467_v0  ;;  %v32_v1 = vld [vmem:[%s614_s0] sm:$0xff]  ;;  %456 = vset.pattern.permute.xlu1 %v468_v2  ;;  %v433_v3 = vld [vmem:[%s615_s3 + $0x38] sm:$0xff]  ;;  %v432_v4 = vld [vmem:[%s615_s3 + $0x30] sm:$0xff] }
   0x2   :  { %36 = vperm.xlu0 %454, %v32_v1   ;;  %49 = vperm.xlu1 %456, %v32_v1   ;;  %v431_v7 = vld [vmem:[%s615_s3 + $0x28] sm:$0xff]  ;;  %v430_v8 = vld [vmem:[%s615_s3 + $0x20] sm:$0xff]  ;;  %v429_v9 = vld [vmem:[%s615_s3 + $0x18] sm:$0xff] }
   0x3   :  { %137 = vmatpush.bf16.msra.mxu0 %v433_v3  ;;  %v428_v10 = vld [vmem:[%s615_s3 + $0x10] sm:$0xff]  ;;  %v427_v11 = vld [vmem:[%s615_s3 + $0x8] sm:$0xff]  ;;  %v426_v12 = vld [vmem:[%s615_s3] sm:$0xff] }
   0x4   :  { %v441_v13 = vld [vmem:[%s618_s5 + $0x38] sm:$0xff]  ;;  %v440_v14 = vld [vmem:[%s618_s5 + $0x30] sm:$0xff]  ;;  %v439_v15 = vld [vmem:[%s618_s5 + $0x28] sm:$0xff] }
   0x5   :  { %220 = vmatpush.bf16.msra.mxu1 %v441_v13  ;;  %v438_v18 = vld [vmem:[%s618_s5 + $0x20] sm:$0xff]  ;;  %v437_v22 = vld [vmem:[%s618_s5 + $0x18] sm:$0xff]  ;;  %v436_v29 = vld [vmem:[%s618_s5 + $0x10] sm:$0xff] }
   0x6   :  { %v33_v19 = vld [vmem:[%s619_s1] sm:$0xf]  ;;  %v435_v39 = vld [vmem:[%s618_s5 + $0x8] sm:$0xff]  ;;  %v449_v41 = vld [vmem:[%s621_s7 + $0x38] sm:$0xff] }
   0x7   :  { %138 = vmatpush.bf16.msra.mxu0 %v432_v4  ;;  %v39_v20 = vperm.slane %v33_v19, 0  ;;  %v45_v21 = vperm.slane %v33_v19, 1  ;;  %v52_v23 = vperm.slane %v33_v19, 2  ;;  %v59_v24 = vperm.slane %v33_v19, 3  ;;  %v459_v34 = vld [vmem:[%s616_s2] ss:$0 sm:$0xff]  ;;  %303 = vmatpush.bf16.msra.mxu2 %v449_v41 }
   0x8   :  { %v434_v40 = vld [vmem:[%s618_s5] sm:$0xff]  ;;  %v448_v42 = vld [vmem:[%s621_s7 + $0x30] sm:$0xff]  ;;  %v447_v43 = vld [vmem:[%s621_s7 + $0x28] sm:$0xff] }
   0x9   :  { %221 = vmatpush.bf16.msra.mxu1 %v440_v14  ;;  %v446_v44 = vld [vmem:[%s621_s7 + $0x20] sm:$0xff]  ;;  %v445_v45 = vld [vmem:[%s621_s7 + $0x18] sm:$0xff]  ;;  %v444_v46 = vld [vmem:[%s621_s7 + $0x10] sm:$0xff] }
   0xa   :  { %455 = vset.pattern.permute.xlu0 %v469_v5  ;;  %457 = vset.pattern.permute.xlu1 %v470_v6  ;;  %v460_v47 = vld [vmem:[%s617_s4] ss:$0 sm:$0xff]  ;;  %v443_v53 = vld [vmem:[%s621_s7 + $0x8] sm:$0xff] }
   0xb   :  { %42 = vperm.xlu0 %455, %v32_v1   ;;  %56 = vperm.xlu1 %457, %v32_v1   ;;  %v442_v54 = vld [vmem:[%s621_s7] sm:$0xff] }
   0xc   :  { %139 = vmatpush.bf16.msra.mxu0 %v431_v7  ;;  %304 = vmatpush.bf16.msra.mxu2 %v448_v42  ;;  %v461_v55 = vld [vmem:[%s620_s6] ss:$0 sm:$0xff] }
   0xd   :  { %222 = vmatpush.bf16.msra.mxu1 %v439_v15  ;;  %v462_v61 = vld [vmem:[%s622_s8] ss:$0 sm:$0xff] }
  0x10   :  { %140 = vmatpush.bf16.msra.mxu0 %v430_v8  ;;  %305 = vmatpush.bf16.msra.mxu2 %v447_v43 }
  0x11   :  { %223 = vmatpush.bf16.msra.mxu1 %v438_v18 }
  0x13   :  { %458 = vset.pattern.permute.xlu0 %v470_v6 }
  0x14   :  { %141 = vmatpush.bf16.msra.mxu0 %v429_v9  ;;  %306 = vmatpush.bf16.msra.mxu2 %v446_v44 }
  0x15   :  { %224 = vmatpush.bf16.msra.mxu1 %v437_v22 }
  0x18   :  { %142 = vmatpush.bf16.msra.mxu0 %v428_v10  ;;  %307 = vmatpush.bf16.msra.mxu2 %v445_v45 }
  0x19   :  { %225 = vmatpush.bf16.msra.mxu1 %v436_v29 }
  0x1c   :  { %143 = vmatpush.bf16.msra.mxu0 %v427_v11  ;;  %308 = vmatpush.bf16.msra.mxu2 %v444_v46 }
  0x1d   :  { %226 = vmatpush.bf16.msra.mxu1 %v435_v39 }
  0x20   :  { %144 = vmatpush.bf16.msra.mxu0 %v426_v12  ;;  %309 = vmatpush.bf16.msra.mxu2 %v443_v53 }
  0x21   :  { %227 = vmatpush.bf16.msra.mxu1 %v434_v40 }
  0x24   :  { %310 = vmatpush.bf16.msra.mxu2 %v442_v54 }
  0x74   :  { %v37_v16 = vpop.permute.xlu0 %36  ;;  %v50_v17 = vpop.permute.xlu1 %49 }
  0x75   :  { %v40_v27 = vmul.f32 %v39_v20, %v37_v16  ;;  %v53_v30 = vmul.f32 %v52_v23, %v50_v17 }
  0x7d   :  { %v43_v25 = vpop.permute.xlu0 %42  ;;  %v57_v26 = vpop.permute.xlu1 %56 }
  0x7e   :  { %v46_v28 = vmul.f32 %v45_v21, %v43_v25  ;;  %v60_v32 = vmul.f32 %v59_v24, %v57_v26 }
  0x80   :  { %v47_v31 = vadd.f32 %v46_v28, %v40_v27 }
  0x82   :  { %v54_v33 = vadd.f32 %v53_v30, %v47_v31 }
  0x84   :  { %v61_v35 = vadd.f32 %v60_v32, %v54_v33 }
  0x86   :  { %v66_v36 = vadd.f32 %v459_v34, %v61_v35 }
  0x88   :  { %v67_v37 = vmax.f32 %v66_v36, 0.0 }
  0x8a   :  { %v68_v38 = vpack.c.bf16 %v67_v37, %v67_v37 }
  0x8c   :  { %145 = vmatmul.bf16.vlgmr.msra.gmra.mxu0 %v68_v38 }
 0x109   :  { %v146_v48 = vpop.f32.mrf.mxu0 }
 0x10a   :  { %v147_v49 = vadd.f32 %v460_v47, %v146_v48 }
 0x10c   :  { %v150_v50 = vmax.f32 %v147_v49, 0.0 }
 0x10e   :  { %v151_v51 = vpack.c.bf16 %v150_v50, %v150_v50 }
 0x110   :  { %228 = vmatmul.bf16.vlgmr.msra.gmra.mxu1 %v151_v51 }
 0x111   :  { %v148_v52 = vpop.f32.mrf.mxu0 }
 0x18d   :  { %v229_v56 = vpop.f32.mrf.mxu1 }
 0x18e   :  { %v230_v57 = vadd.f32 %v461_v55, %v229_v56 }
 0x190   :  { %v233_v58 = vmax.f32 %v230_v57, 0.0 }
 0x192   :  { %v234_v59 = vpack.c.bf16 %v233_v58, %v233_v58 }
 0x194   :  { %311 = vmatmul.bf16.vlgmr.msra.gmra.mxu2 %v234_v59 }
 0x195   :  { %v231_v60 = vpop.f32.mrf.mxu1 }
 0x217   :  { %v312_v62 = vpop.f32.mrf.mxu2 }
 0x218   :  { %v313_v63 = vadd.f32 %v462_v61, %v312_v62 }
 0x21a   :  { %316 = vmax.xlane.f32.xlu2 %v313_v63 }
 0x21f   :  { %v314_v0 = vpop.f32.mrf.mxu2 }
 0x28d   :  { %v317_v1 = vpop.xlane.xlu2 %316 }
 0x28e   :  { %v318_v2 = vsub.f32 %v313_v63, %v317_v1 }
 0x290   :  { %v319_v3 = vmul.f32 1.442695, %v318_v2 }
 0x292   :  { %463 = vpow2.f32 %v319_v3 }
 0x298   :  { %v464_v4 = vpop.eup %463 }
 0x299   :  { %321 = vadd.xlane.f32.xlu2 %v464_v4 }
 0x30c   :  { %v322_v5 = vpop.xlane.xlu2 %321 }
 0x30d   :  { %465 = vrcp.f32 %v322_v5 }
 0x313   :  { %v466_v6 = vpop.eup %465 }
 0x314   :  { %v324_v7 = vmul.f32 %v466_v6, %v464_v4 }
 0x316   :  { %325 = vst [vmem:[%s623_s9] sm:$0xff] %v324_v7 }

</bundles_post_ra>
